<compile_context>
chip_gen: v6e
topology: v6e:2x2x1
jax: 0.10.0
libtpu: 0.0.40
codegen_flags: <defaults>
</compile_context>

<pallas_src>
import functools

import jax
import jax.numpy as jnp
from jax.experimental import pallas as pl
from jax.experimental.pallas import tpu as pltpu


def _round_up(n, m):
    return ((n + m - 1) // m) * m


def _mlp_kernel(x_ref, w1_ref, b1_ref, w2_ref, b2_ref, w3_ref, b3_ref, o_ref):
    # fc1 (bf16 MXU, f32 accumulate) + bias/ReLU in f32
    h1 = jnp.dot(x_ref[...], w1_ref[...], preferred_element_type=jnp.float32)
    h1 = jnp.maximum(h1 + b1_ref[...], 0.0)
    # fc2
    h2 = jnp.dot(h1.astype(w2_ref.dtype), w2_ref[...],
                 preferred_element_type=jnp.float32)
    h2 = jnp.maximum(h2 + b2_ref[...], 0.0)
    # fc3 + sigmoid (f32 epilogue)
    h3 = jnp.dot(h2.astype(w3_ref.dtype), w3_ref[...],
                 preferred_element_type=jnp.float32)
    o_ref[...] = jax.nn.sigmoid(h3 + b3_ref[...]).astype(o_ref.dtype)


@functools.partial(jax.jit, static_argnames=("block_b",))
def mlp_forward(x, params, block_b=256):
    """MLP forward pass with a single fused Pallas kernel.

    x:      [B, input_dim] float32
    params: dict with w1 [in,128], b1 [1,128], w2 [128,64], b2 [1,64],
            w3 [64,out], b3 [1,out]  (all float32; weights are the transpose
            of PyTorch's [out, in] layout so the kernel does x @ W + b).
    """
    w1, b1 = params["w1"], params["b1"]
    w2, b2 = params["w2"], params["b2"]
    w3, b3 = params["w3"], params["b3"]

    B, in_dim = x.shape
    h1_dim = w1.shape[1]
    h2_dim = w2.shape[1]
    out_dim = w3.shape[1]

    # Lane-dense padding of the small feature dims to multiples of 128.
    in_pad = _round_up(max(in_dim, 128), 128)
    out_pad = _round_up(max(out_dim, 128), 128)

    # Batch tile: multiple of 8 sublanes, clamped so tiny batches still work;
    # batch is zero-padded to a multiple of the tile (sliced off at the end).
    bb = max(8, _round_up(min(block_b, _round_up(B, 8)), 8))
    b_pad = _round_up(B, bb)
    grid = (b_pad // bb,)

    # Pad + cast matmul operands to bf16 (biases stay f32 for the epilogue).
    x_p = jnp.pad(x, ((0, b_pad - B), (0, in_pad - in_dim))).astype(jnp.bfloat16)
    w1_p = jnp.pad(w1, ((0, in_pad - in_dim), (0, 0))).astype(jnp.bfloat16)
    w2_p = w2.astype(jnp.bfloat16)
    w3_p = jnp.pad(w3, ((0, 0), (0, out_pad - out_dim))).astype(jnp.bfloat16)
    b3_p = jnp.pad(b3, ((0, 0), (0, out_pad - out_dim)))

    # Advisory cost estimate for the XLA scheduler.
    flops = 2 * b_pad * (in_pad * h1_dim + h1_dim * h2_dim + h2_dim * out_pad)
    transcendentals = b_pad * out_pad  # sigmoid
    bytes_accessed = (
        x_p.size * 2 + w1_p.size * 2 + w2_p.size * 2 + w3_p.size * 2
        + (b1.size + b2.size + b3_p.size) * 4
        + b_pad * out_pad * 4
    )
    cost = pl.CostEstimate(flops=flops, transcendentals=transcendentals,
                           bytes_accessed=bytes_accessed)

    # Explicit VMEM budget with headroom (stays well under v7x's 64 MiB).
    vmem_bytes = (
        2 * bb * in_pad * 2                                      # x tile, 2 bufs
        + 2 * bb * out_pad * 4                                   # out tile, 2 bufs
        + (in_pad * h1_dim + h1_dim * h2_dim + h2_dim * out_pad) * 2  # weights
        + (h1_dim + h2_dim + out_pad) * 4                        # biases
        + bb * (h1_dim + h2_dim + out_pad) * 4                   # intermediates
    )
    vmem_limit = min(2 * vmem_bytes + (4 << 20), 64 << 20)

    out_padded = pl.pallas_call(
        _mlp_kernel,
        out_shape=jax.ShapeDtypeStruct((b_pad, out_pad), jnp.float32),
        grid=grid,
        in_specs=[
            pl.BlockSpec((bb, in_pad), lambda i: (i, 0)),        # x tile
            pl.BlockSpec((in_pad, h1_dim), lambda i: (0, 0)),    # w1 (resident)
            pl.BlockSpec((1, h1_dim), lambda i: (0, 0)),         # b1
            pl.BlockSpec((h1_dim, h2_dim), lambda i: (0, 0)),    # w2
            pl.BlockSpec((1, h2_dim), lambda i: (0, 0)),         # b2
            pl.BlockSpec((h2_dim, out_pad), lambda i: (0, 0)),   # w3
            pl.BlockSpec((1, out_pad), lambda i: (0, 0)),        # b3
        ],
        out_specs=pl.BlockSpec((bb, out_pad), lambda i: (i, 0)),
        compiler_params=pltpu.CompilerParams(
            dimension_semantics=("parallel",),
            vmem_limit_bytes=vmem_limit,
        ),
        cost_estimate=cost,
    )(x_p, w1_p, b1, w2_p, b2, w3_p, b3_p)

    return out_padded[:B, :out_dim]


def init_params(key, input_dim, output_dim):
    """Deterministic parameter init (shapes match the PyTorch module)."""
    ks = jax.random.split(key, 6)

    def lin(kw, kb, fan_in, fan_out):
        bound = 1.0 / jnp.sqrt(fan_in)
        w = jax.random.uniform(kw, (fan_in, fan_out), jnp.float32, -bound, bound)
        b = jax.random.uniform(kb, (1, fan_out), jnp.float32, -bound, bound)
        return w, b

    w1, b1 = lin(ks[0], ks[1], input_dim, 128)
    w2, b2 = lin(ks[2], ks[3], 128, 64)
    w3, b3 = lin(ks[4], ks[5], 64, output_dim)
    return {"w1": w1, "b1": b1, "w2": w2, "b2": b2, "w3": w3, "b3": b3}


def mlp_reference(x, p):
    """Pure-JAX f32 reference for correctness checking."""
    h = jnp.maximum(x @ p["w1"] + p["b1"], 0.0)
    h = jnp.maximum(h @ p["w2"] + p["b2"], 0.0)
    return jax.nn.sigmoid(h @ p["w3"] + p["b3"])


if __name__ == "__main__":
    key = jax.random.PRNGKey(0)
    k_x, k_p, k_x2 = jax.random.split(key, 3)

    # Small primary test (shapes consistent with the module).
    batch, input_dim, output_dim = 8, 32, 16
    x = jax.random.normal(k_x, (batch, input_dim), jnp.float32)
    params = init_params(k_p, input_dim, output_dim)

    out = jax.block_until_ready(mlp_forward(x, params))
    ref = mlp_reference(x, params)
    assert out.shape == (batch, output_dim)
    # bf16 matmul inputs, f32 accumulate/epilogue -> loosened tolerance.
    assert jnp.max(jnp.abs(out - ref)) < 2.5e-2, "mismatch vs reference (small)"

    # Second test: multi-tile grid + non-divisible batch (padding path).
    batch2 = 384
    x2 = jax.random.normal(k_x2, (batch2, input_dim), jnp.float32)
    out2 = jax.block_until_ready(mlp_forward(x2, params, block_b=256))
    ref2 = mlp_reference(x2, params)
    assert out2.shape == (batch2, output_dim)
    assert jnp.max(jnp.abs(out2 - ref2)) < 2.5e-2, "mismatch vs reference (tiled)"

    print("KERNEL_OK")
</pallas_src>

<mosaic_0001>
module attributes {stable_mosaic.version = 11 : i64} {
  func.func @_mlp_kernel(%arg0: i32, %arg1: memref<8x128xbf16, #tpu.memory_space<vmem>>, %arg2: memref<128x128xbf16, #tpu.memory_space<vmem>>, %arg3: memref<1x128xf32, #tpu.memory_space<vmem>>, %arg4: memref<128x64xbf16, #tpu.memory_space<vmem>>, %arg5: memref<1x64xf32, #tpu.memory_space<vmem>>, %arg6: memref<64x128xbf16, #tpu.memory_space<vmem>>, %arg7: memref<1x128xf32, #tpu.memory_space<vmem>>, %arg8: memref<8x128xf32, #tpu.memory_space<vmem>>) attributes {dimension_semantics = [#tpu.dimension_semantics<parallel>], iteration_bounds = array<i64: 1>, scalar_prefetch = 0 : i64, scratch_operands = 0 : i64, tpu.core_type = #tpu.core_type<tc>, window_params = [{transform_indices = @transform_0, window_bounds = array<i64: 8, 128>}, {pipeline_mode = #tpu.pipeline_mode<synchronous>, transform_indices = @transform_1, window_bounds = array<i64: 128, 128>}, {pipeline_mode = #tpu.pipeline_mode<synchronous>, transform_indices = @transform_2, window_bounds = array<i64: 1, 128>}, {pipeline_mode = #tpu.pipeline_mode<synchronous>, transform_indices = @transform_3, window_bounds = array<i64: 128, 64>}, {pipeline_mode = #tpu.pipeline_mode<synchronous>, transform_indices = @transform_4, window_bounds = array<i64: 1, 64>}, {pipeline_mode = #tpu.pipeline_mode<synchronous>, transform_indices = @transform_5, window_bounds = array<i64: 64, 128>}, {pipeline_mode = #tpu.pipeline_mode<synchronous>, transform_indices = @transform_6, window_bounds = array<i64: 1, 128>}, {transform_indices = @transform_7, window_bounds = array<i64: 8, 128>}]} {
    %c0 = arith.constant 0 : index
    %c0_0 = arith.constant 0 : index
    %0 = vector.load %arg1[%c0, %c0_0] : memref<8x128xbf16, #tpu.memory_space<vmem>>, vector<8x128xbf16>
    %c0_1 = arith.constant 0 : index
    %c0_2 = arith.constant 0 : index
    %1 = vector.load %arg2[%c0_1, %c0_2] : memref<128x128xbf16, #tpu.memory_space<vmem>>, vector<128x128xbf16>
    %cst = arith.constant dense<0.000000e+00> : vector<8x128xf32>
    %2 = tpu.matmul %0, %1, %cst {dimension_numbers = #tpu.dot_dimension_numbers<[1], [0], [0], [1], [0, 0, 1, 1], [], []>} : vector<8x128xbf16>, vector<128x128xbf16>, vector<8x128xf32> -> vector<8x128xf32>
    %c0_3 = arith.constant 0 : index
    %c0_4 = arith.constant 0 : index
    %3 = vector.load %arg3[%c0_3, %c0_4] : memref<1x128xf32, #tpu.memory_space<vmem>>, vector<1x128xf32>
    %4 = vector.broadcast %3 : vector<1x128xf32> to vector<8x128xf32>
    %5 = arith.addf %2, %4 : vector<8x128xf32>
    %cst_5 = arith.constant 0.000000e+00 : f32
    %6 = vector.broadcast %cst_5 : f32 to vector<8x128xf32>
    %7 = arith.maximumf %5, %6 : vector<8x128xf32>
    %8 = arith.truncf %7 : vector<8x128xf32> to vector<8x128xbf16>
    %c0_6 = arith.constant 0 : index
    %c0_7 = arith.constant 0 : index
    %9 = vector.load %arg4[%c0_6, %c0_7] : memref<128x64xbf16, #tpu.memory_space<vmem>>, vector<128x64xbf16>
    %cst_8 = arith.constant dense<0.000000e+00> : vector<8x64xf32>
    %10 = tpu.matmul %8, %9, %cst_8 {dimension_numbers = #tpu.dot_dimension_numbers<[1], [0], [0], [1], [0, 0, 1, 1], [], []>} : vector<8x128xbf16>, vector<128x64xbf16>, vector<8x64xf32> -> vector<8x64xf32>
    %c0_9 = arith.constant 0 : index
    %c0_10 = arith.constant 0 : index
    %11 = vector.load %arg5[%c0_9, %c0_10] : memref<1x64xf32, #tpu.memory_space<vmem>>, vector<1x64xf32>
    %12 = vector.broadcast %11 : vector<1x64xf32> to vector<8x64xf32>
    %13 = arith.addf %10, %12 : vector<8x64xf32>
    %cst_11 = arith.constant 0.000000e+00 : f32
    %14 = vector.broadcast %cst_11 : f32 to vector<8x64xf32>
    %15 = arith.maximumf %13, %14 : vector<8x64xf32>
    %16 = arith.truncf %15 : vector<8x64xf32> to vector<8x64xbf16>
    %c0_12 = arith.constant 0 : index
    %c0_13 = arith.constant 0 : index
    %17 = vector.load %arg6[%c0_12, %c0_13] : memref<64x128xbf16, #tpu.memory_space<vmem>>, vector<64x128xbf16>
    %cst_14 = arith.constant dense<0.000000e+00> : vector<8x128xf32>
    %18 = tpu.matmul %16, %17, %cst_14 {dimension_numbers = #tpu.dot_dimension_numbers<[1], [0], [0], [1], [0, 0, 1, 1], [], []>} : vector<8x64xbf16>, vector<64x128xbf16>, vector<8x128xf32> -> vector<8x128xf32>
    %c0_15 = arith.constant 0 : index
    %c0_16 = arith.constant 0 : index
    %19 = vector.load %arg7[%c0_15, %c0_16] : memref<1x128xf32, #tpu.memory_space<vmem>>, vector<1x128xf32>
    %20 = vector.broadcast %19 : vector<1x128xf32> to vector<8x128xf32>
    %21 = arith.addf %18, %20 : vector<8x128xf32>
    %22 = arith.negf %21 : vector<8x128xf32>
    %23 = math.exp %22 : vector<8x128xf32>
    %cst_17 = arith.constant 1.000000e+00 : f32
    %24 = vector.broadcast %cst_17 : f32 to vector<8x128xf32>
    %25 = arith.addf %24, %23 : vector<8x128xf32>
    %26 = arith.divf %24, %25 : vector<8x128xf32>
    %c0_18 = arith.constant 0 : index
    %c0_19 = arith.constant 0 : index
    %27 = vector.load %arg8[%c0_18, %c0_19] : memref<8x128xf32, #tpu.memory_space<vmem>>, vector<8x128xf32>
    tpu.vector_store %arg8[%c0_18, %c0_19], %26 {strides = array<i32>} : memref<8x128xf32, #tpu.memory_space<vmem>>, vector<8x128xf32>,
    return
  }
  func.func @transform_0(%arg0: i32) -> (i32, i32) {
    %c0_i32 = arith.constant 0 : i32
    %c0_i32_0 = arith.constant 0 : i32
    return %arg0, %c0_i32 : i32, i32
  }
  func.func @transform_1(%arg0: i32) -> (i32, i32) {
    %c0_i32 = arith.constant 0 : i32
    %c0_i32_0 = arith.constant 0 : i32
    %c0_i32_1 = arith.constant 0 : i32
    return %c0_i32, %c0_i32_0 : i32, i32
  }
  func.func @transform_2(%arg0: i32) -> (i32, i32) {
    %c0_i32 = arith.constant 0 : i32
    %c0_i32_0 = arith.constant 0 : i32
    %c0_i32_1 = arith.constant 0 : i32
    return %c0_i32, %c0_i32_0 : i32, i32
  }
  func.func @transform_3(%arg0: i32) -> (i32, i32) {
    %c0_i32 = arith.constant 0 : i32
    %c0_i32_0 = arith.constant 0 : i32
    %c0_i32_1 = arith.constant 0 : i32
    return %c0_i32, %c0_i32_0 : i32, i32
  }
  func.func @transform_4(%arg0: i32) -> (i32, i32) {
    %c0_i32 = arith.constant 0 : i32
    %c0_i32_0 = arith.constant 0 : i32
    %c0_i32_1 = arith.constant 0 : i32
    return %c0_i32, %c0_i32_0 : i32, i32
  }
  func.func @transform_5(%arg0: i32) -> (i32, i32) {
    %c0_i32 = arith.constant 0 : i32
    %c0_i32_0 = arith.constant 0 : i32
    %c0_i32_1 = arith.constant 0 : i32
    return %c0_i32, %c0_i32_0 : i32, i32
  }
  func.func @transform_6(%arg0: i32) -> (i32, i32) {
    %c0_i32 = arith.constant 0 : i32
    %c0_i32_0 = arith.constant 0 : i32
    %c0_i32_1 = arith.constant 0 : i32
    return %c0_i32, %c0_i32_0 : i32, i32
  }
  func.func @transform_7(%arg0: i32) -> (i32, i32) {
    %c0_i32 = arith.constant 0 : i32
    %c0_i32_0 = arith.constant 0 : i32
    return %arg0, %c0_i32 : i32, i32
  }
}

</mosaic_0001>

<bundles_post_ra>
// kernel: mlp_forward.1
= control target key start
LH: loop header
LB: loop body
LE: loop exit
PB: predicated region body
PF: predicated region fallthrough
CT: control target
= control target key end

     0   :  { %v508_v1 = vmov 0.0   ;;  %vm509_vm0 = vmmov 0   ;;  %s652_s0 = inlined_call_operand.vmem [shape: bf16[8,128], index: 0, kind: input, shape index: {}]   ;;  %s653_s1 = inlined_call_operand.vmem [shape: bf16[128,128], index: 1, kind: input, shape index: {}]   ;;  %s654_s2 = inlined_call_operand.vmem [shape: f32[1,128], index: 2, kind: input, shape index: {}]   ;;  %s655_s3 = inlined_call_operand.vmem [shape: bf16[128,64], index: 3, kind: input, shape index: {}]   ;;  %s656_s4 = inlined_call_operand.vmem [shape: f32[1,64], index: 4, kind: input, shape index: {}]   ;;  %s657_s5 = inlined_call_operand.vmem [shape: bf16[64,128], index: 5, kind: input, shape index: {}]   ;;  %s658_s6 = inlined_call_operand.vmem [shape: f32[1,128], index: 6, kind: input, shape index: {}]   ;;  %s659_s7 = inlined_call_operand.hbm [shape: f32[8,128], index: 7, kind: output, shape index: {}]  }
   0x1   :  { %v462_v0 = vld [vmem:[%s653_s1 + $0x38] sm:$0xff]   ;;  %407 = vmatprep.subr.bf16.mxu0 %v508_v1  ;;  %427 = vmatprep.subr.bf16.mxu1 %v508_v1  ;;  %v463_v2 = vld [vmem:[%s653_s1 + $0x30] sm:$0xff]   ;;  %v464_v3 = vld [vmem:[%s653_s1 + $0x28] sm:$0xff]  }
   0x2   :  { %408 = vmatpush3.bf16.msra.mxu0 %v462_v0  ;;  %423 = vmatprep.mubr.msk.bf16.mxu0 %vm509_vm0, %v508_v1  ;;  %v470_v4 = vld [vmem:[%s655_s3 + $0x38] sm:$0xff]   ;;  %v465_v5 = vld [vmem:[%s653_s1 + $0x20] sm:$0xff]   ;;  %v471_v6 = vld [vmem:[%s655_s3 + $0x30] sm:$0xff]  }
   0x3   :  { %409 = vmatprep.subr.bf16.mxu0 %v508_v1  ;;  %443 = vmatprep.mubr.msk.bf16.mxu1 %vm509_vm0, %v508_v1  ;;  %v466_v7 = vld [vmem:[%s653_s1 + $0x18] sm:$0xff]   ;;  %v472_v8 = vld [vmem:[%s655_s3 + $0x28] sm:$0xff]   ;;  %v467_v9 = vld [vmem:[%s653_s1 + $0x10] sm:$0xff]  }
   0x4   :  { %428 = vmatpush3.bf16.msra.mxu1 %v470_v4 }
   0x5   :  { %429 = vmatprep.subr.bf16.mxu1 %v508_v1 }
   0x6   :  { %410 = vmatpush3.bf16.msra.mxu0 %v463_v2 }
   0x7   :  { %411 = vmatprep.subr.bf16.mxu0 %v508_v1 }
   0x8   :  { %430 = vmatpush3.bf16.msra.mxu1 %v471_v6 }
   0x9   :  { %431 = vmatprep.subr.bf16.mxu1 %v508_v1 }
   0xa   :  { %412 = vmatpush3.bf16.msra.mxu0 %v464_v3 }
   0xb   :  { %413 = vmatprep.subr.bf16.mxu0 %v508_v1 }
   0xe   :  { %414 = vmatpush3.bf16.msra.mxu0 %v465_v5 }
   0xf   :  { %415 = vmatprep.subr.bf16.mxu0 %v508_v1 }
  0x12   :  { %416 = vmatpush3.bf16.msra.mxu0 %v466_v7 }
  0x13   :  { %12 = vsyncpa [#allocation3], 0  ;;  %417 = vmatprep.subr.bf16.mxu0 %v508_v1  ;;  %432 = vmatpush3.bf16.msra.mxu1 %v472_v8  ;;  %v473_v10 = vld [vmem:[%s655_s3 + $0x20] sm:$0xff]   ;;  %v468_v11 = vld [vmem:[%s653_s1 + $0x8] sm:$0xff]   ;;  %vm294_vm1 = vcmask 523264  }
  0x14   :  { %433 = vmatprep.subr.bf16.mxu1 %v508_v1  ;;  %v474_v12 = vld [vmem:[%s655_s3 + $0x18] sm:$0xff]   ;;  %v469_v13 = vld [vmem:[%s653_s1] sm:$0xff]   ;;  %v475_v14 = vld [vmem:[%s655_s3 + $0x10] sm:$0xff]  }
  0x15   :  { %v28_v15 = vld [vmem:[%s652_s0] sm:$0xf]  ;;  %v476_v16 = vld [vmem:[%s655_s3 + $0x8] sm:$0xff]   ;;  %v478_v18 = vld [vmem:[%s657_s5 + $0x18] sm:$0xff]  }
  0x16   :  { %418 = vmatpush3.bf16.msra.mxu0 %v467_v9  ;;  %v477_v17 = vld [vmem:[%s655_s3] sm:$0xff]   ;;  %v479_v19 = vld [vmem:[%s657_s5 + $0x10] sm:$0xff]   ;;  %v480_v28 = vld [vmem:[%s657_s5 + $0x8] sm:$0xff]  }
  0x17   :  { %419 = vmatprep.subr.bf16.mxu0 %v508_v1  ;;  %434 = vmatpush3.bf16.msra.mxu1 %v473_v10  ;;  %v359_v20 = vld [vmem:[%s654_s2] ss:$0 sm:$0xff] }
  0x18   :  { %435 = vmatprep.subr.bf16.mxu1 %v508_v1  ;;  %v481_v29 = vld [vmem:[%s657_s5] sm:$0xff]  }
  0x19   :  { %v368_v30 = vld [vmem:[%s656_s4] ss:$0 sm:$0xff]  ;;  %s510_s4 = smov [#allocation2]  }
  0x1a   :  { %420 = vmatpush3.bf16.msra.mxu0 %v468_v11  ;;  %v377_v38 = vld [vmem:[%s658_s6] ss:$0 sm:$0xff]  ;;  %s351_s5 = sshll.u32 %s510_s4, 4  ;;  %s352_s5 = int_to_ptr.vmem [resolvable:$true] %s351_s5 }
  0x1b   :  { %421 = vmatprep.subr.bf16.mxu0 %v508_v1  ;;  %436 = vmatpush3.bf16.msra.mxu1 %v474_v12  ;;  %s486_s22 = scalar_lea.vmem %s352_s5, 128  ;;  %p491_p1 = scmp.lt.s32.totalorder %s352_s5, %s352_s5 }
  0x1c   :  { %437 = vmatprep.subr.bf16.mxu1 %v508_v1  ;;  %p487_p0 = scmp.ne.s32.totalorder %s352_s5, %s486_s22  ;;  %p492_p2 = scmp.lt.s32.totalorder %s486_s22, %s486_s22 }
  0x1e   :  { %422 = vmatpush3.bf16.msra.mxu0 %v469_v13  ;;  %p493_p3 = por %p492_p2, %p491_p1 }
  0x1f   :  { %438 = vmatpush3.bf16.msra.mxu1 %v475_v14  ;;  %447 = vmatprep.subr.bf16.mxu0 %v508_v1 }
  0x20   :  { %439 = vmatprep.subr.bf16.mxu1 %v508_v1  ;;  %p494_p4 = pnand %p493_p3, %p487_p0 }
  0x21   :  { %424 = vmatmul.mubr.bf16.vlgmr.msra.gmra.mxu0 %v28_v15 }
  0x22   :  { %455 = vmatprep.mubr.msk.bf16.mxu0 %vm509_vm0, %v508_v1  ;;  %448 = vmatpush3.bf16.msra.mxu0 %v478_v18 }
  0x23   :  { %440 = vmatpush3.bf16.msra.mxu1 %v476_v16  ;;  %449 = vmatprep.subr.bf16.mxu0 %v508_v1 }
  0x24   :  { %441 = vmatprep.subr.bf16.mxu1 %v508_v1 }
  0x26   :  { %450 = vmatpush3.bf16.msra.mxu0 %v479_v19 }
  0x27   :  { %442 = vmatpush3.bf16.msra.mxu1 %v477_v17  ;;  %451 = vmatprep.subr.bf16.mxu0 %v508_v1 }
  0x2a   :  { %452 = vmatpush3.bf16.msra.mxu0 %v480_v28 }
  0x2b   :  { %453 = vmatprep.subr.bf16.mxu0 %v508_v1 }
  0x2e   :  { %454 = vmatpush3.bf16.msra.mxu0 %v481_v29 }
  0xe1   :  { %v134_v21 = vpop.f32.mrf.mxu0 }
  0xe2   :  { %v135_v22 = vadd.f32 %v359_v20, %v134_v21 }
  0xe3   :  { %v425_v23 = vpop.f32.mrf.mxu0 }
  0xe4   :  { %v140_v24 = vmax.f32 %v135_v22, 0.0 }
  0xe5   :  { %v137_v25 = vpop.f32.mrf.mxu0 }
  0xe6   :  { %v141_v26 = vpack.c.bf16 %v140_v24, %v140_v24 }
  0xe7   :  { %v426_v27 = vpop.f32.mrf.mxu0 }
  0xe8   :  { %444 = vmatmul.mubr.bf16.vlgmr.msra.gmra.mxu1 %v141_v26 }
 0x1a8   :  { %v247_v31 = vpop.f32.mrf.mxu1 }
 0x1a9   :  { %v248_v32 = vadd.f32 %v368_v30, %v247_v31 }
 0x1aa   :  { %v445_v33 = vpop.f32.mrf.mxu1 }
 0x1ab   :  { %v253_v34 = vmax.f32 %v248_v32, 0.0 }
 0x1ac   :  { %v250_v35 = vpop.f32.mrf.mxu1 }
 0x1ad   :  { %v254_v36 = vpack.c.bf16 %v253_v34, %v253_v34 }
 0x1ae   :  { %v446_v37 = vpop.f32.mrf.mxu1 }
 0x1af   :  { %456 = vmatmul.mubr.msk.bf16.vlgmr.msra.gmra.mxu0 %vm294_vm1, %v254_v36 }
 0x26f   :  { %v332_v39 = vpop.f32.mrf.mxu0 }
 0x270   :  { %v333_v40 = vadd.f32 %v377_v38, %v332_v39 }
 0x271   :  { %v457_v41 = vpop.f32.mrf.mxu0 }
 0x272   :  { %v383_v42 = vmul.f32 -1.442695, %v333_v40 }
 0x273   :  { %v335_v43 = vpop.f32.mrf.mxu0 }
 0x274   :  { %482 = vpow2.f32 %v383_v42 }
 0x275   :  { %v458_v44 = vpop.f32.mrf.mxu0 }
 0x281   :  { %v483_v45 = vpop.eup %482 }
 0x282   :  { %v341_v46 = vadd.f32 1.0, %v483_v45 }
 0x284   :  { %484 = vrcp.f32 %v341_v46 }
 0x291   :  { %v485_v47 = vpop.eup %484 }
 0x292   :  { %344 = vst [vmem:[#allocation2] sm:$0xff] %v485_v47 }
 0x293   :  { %497 = shalt.err (!%p494_p4)
}
 0x294   :  { %354 = dma.vmem_to_hbm [thread:$0]  %s352_s5, 128, %s659_s7, [#allocation3]  }
 0x295   :  { %506 = dma.done.wait [#allocation3], 128  }
 0x296   :  { %507 = vsyncadd [#allocation3], 4294967168 }
 0x297   :  { %358 = vsyncpa [#allocation3], 1 }

</bundles_post_ra>
